<compile_context>
chip_gen: v7x
topology: tpu7x:2x2x1
jax: 0.10.0
libtpu: 0.0.40
codegen_flags: <defaults>
</compile_context>

<pallas_src>
import jax
import jax.numpy as jnp
from jax.experimental import pallas as pl
from jax.experimental.pallas import tpu as pltpu


def _round_up(x, m):
    return ((x + m - 1) // m) * m


def _siamese_mlp_kernel(x_ref, w1_ref, b1_ref, w2_ref, b2_ref, w3_ref, b3_ref,
                        o_ref):
    """3-layer MLP (Linear+ReLU, Linear+ReLU, Linear) for one branch.

    The grid axis (size 2) selects the branch; weights are shared (constant
    block index) so they are fetched once and stay resident in VMEM.
    Matmul inputs are bf16, accumulation is f32.
    """
    x = x_ref[...]                                   # (B, D) bf16

    # Layer 1: Linear(D -> D/2) + ReLU
    h1 = jnp.dot(x, w1_ref[...], preferred_element_type=jnp.float32) + b1_ref[...]
    h1 = jnp.maximum(h1, 0.0).astype(jnp.bfloat16)

    # Layer 2: Linear(D/2 -> D/4) + ReLU
    h2 = jnp.dot(h1, w2_ref[...], preferred_element_type=jnp.float32) + b2_ref[...]
    h2 = jnp.maximum(h2, 0.0).astype(jnp.bfloat16)

    # Layer 3: Linear(D/4 -> D/8 padded to 128 lanes), no activation
    h3 = jnp.dot(h2, w3_ref[...], preferred_element_type=jnp.float32) + b3_ref[...]

    o_ref[...] = h3.astype(o_ref.dtype)              # lane-dense (B, d_pad) store


def siamese_forward(input1, input2, params):
    """Matches SiameseNetwork.forward: flatten both inputs, run the shared MLP.

    Both branches are processed by a single pallas_call with a size-2
    "parallel" grid axis (one grid point per branch).
    """
    w1, b1, w2, b2, w3, b3 = params
    B = input1.shape[0]
    D = w1.shape[0]
    d_pad = w3.shape[1]
    d_out = D // 8

    # Stack the two branches on a leading axis; cast activations to bf16 for
    # the MXU (weights are already bf16, accumulation stays f32 in-kernel).
    x = jnp.stack(
        [input1.reshape(B, -1), input2.reshape(B, -1)], axis=0
    ).astype(jnp.bfloat16)                           # (2, B, D)

    shared = lambda shape: pl.BlockSpec(shape, lambda g: (0,) * len(shape))

    out = pl.pallas_call(
        _siamese_mlp_kernel,
        out_shape=jax.ShapeDtypeStruct((2, B, d_pad), jnp.float32),
        grid=(2,),
        in_specs=[
            # Branch-sliced activations: leading dim squeezed away in-kernel.
            pl.BlockSpec((None, B, D), lambda g: (g, 0, 0)),
            # Weights/biases: same block every grid step -> DMA'd once, resident.
            shared(w1.shape), shared(b1.shape),
            shared(w2.shape), shared(b2.shape),
            shared(w3.shape), shared(b3.shape),
        ],
        out_specs=pl.BlockSpec((None, B, d_pad), lambda g: (g, 0, 0)),
        compiler_params=pltpu.CompilerParams(
            dimension_semantics=("parallel",),       # shard branches across TCs on v7x
        ),
    )(x, w1, b1, w2, b2, w3, b3)

    # Strip the lane padding of the final layer.
    return out[0, :, :d_out], out[1, :, :d_out]


def init_params(image_size, key):
    """Deterministic init mimicking nn.Linear (uniform +-1/sqrt(fan_in)).

    Weights are stored transposed to (in_features, out_features) and cast to
    bfloat16; biases are float32 with shape (1, out_features).  The last
    layer's output features are zero-padded to a multiple of 128 lanes.
    """
    d = image_size ** 2
    dims = [d, d // 2, d // 4, d // 8]
    d_pad = _round_up(dims[-1], 128)

    params = []
    keys = jax.random.split(key, 6)
    for i in range(3):
        fan_in, fan_out = dims[i], dims[i + 1]
        bound = 1.0 / float(jnp.sqrt(jnp.float32(fan_in)))
        w = jax.random.uniform(keys[2 * i], (fan_in, fan_out),
                               minval=-bound, maxval=bound, dtype=jnp.float32)
        b = jax.random.uniform(keys[2 * i + 1], (1, fan_out),
                               minval=-bound, maxval=bound, dtype=jnp.float32)
        if i == 2:  # pad final layer to a lane-dense output width
            pad = d_pad - fan_out
            w = jnp.pad(w, ((0, 0), (0, pad)))
            b = jnp.pad(b, ((0, 0), (0, pad)))
        params += [w.astype(jnp.bfloat16), b]
    return tuple(params)


def reference_forward(input1, input2, params):
    """Pure-JAX reference with the same bf16-matmul / f32-accumulate numerics."""
    w1, b1, w2, b2, w3, b3 = params
    d_out = w1.shape[0] // 8

    def once(x):
        x = x.astype(jnp.bfloat16)
        h = jnp.maximum(
            jnp.dot(x, w1, preferred_element_type=jnp.float32) + b1, 0.0
        ).astype(jnp.bfloat16)
        h = jnp.maximum(
            jnp.dot(h, w2, preferred_element_type=jnp.float32) + b2, 0.0
        ).astype(jnp.bfloat16)
        out = jnp.dot(h, w3, preferred_element_type=jnp.float32) + b3
        return out[:, :d_out]

    B = input1.shape[0]
    return once(input1.reshape(B, -1)), once(input2.reshape(B, -1))


if __name__ == "__main__":
    image_size = 16          # input_size = 256 -> 128 -> 64 -> 32
    batch = 2

    key = jax.random.PRNGKey(0)
    k_p, k_x1, k_x2 = jax.random.split(key, 3)

    params = init_params(image_size, k_p)
    input1 = jax.random.normal(k_x1, (batch, image_size, image_size),
                               dtype=jnp.float32)
    input2 = jax.random.normal(k_x2, (batch, image_size, image_size),
                               dtype=jnp.float32)

    out1, out2 = siamese_forward(input1, input2, params)
    out1 = jax.block_until_ready(out1)
    out2 = jax.block_until_ready(out2)

    ref1, ref2 = reference_forward(input1, input2, params)
    assert out1.shape == (batch, image_size ** 2 // 8)
    assert out2.shape == (batch, image_size ** 2 // 8)
    assert jnp.allclose(out1, ref1, atol=1e-2, rtol=1e-2)
    assert jnp.allclose(out2, ref2, atol=1e-2, rtol=1e-2)

    print("KERNEL_OK")
</pallas_src>

<mosaic_0001>
module attributes {stable_mosaic.version = 11 : i64} {
  func.func @_siamese_mlp_kernel(%arg0: i32, %arg1: memref<1x2x256xbf16, #tpu.memory_space<vmem>>, %arg2: memref<256x128xbf16, #tpu.memory_space<vmem>>, %arg3: memref<1x128xf32, #tpu.memory_space<vmem>>, %arg4: memref<128x64xbf16, #tpu.memory_space<vmem>>, %arg5: memref<1x64xf32, #tpu.memory_space<vmem>>, %arg6: memref<64x128xbf16, #tpu.memory_space<vmem>>, %arg7: memref<1x128xf32, #tpu.memory_space<vmem>>, %arg8: memref<1x2x128xf32, #tpu.memory_space<vmem>>) attributes {dimension_semantics = [#tpu.dimension_semantics<parallel>], iteration_bounds = array<i64: 2>, scalar_prefetch = 0 : i64, scratch_operands = 0 : i64, tpu.core_type = #tpu.core_type<tc>, window_params = [{transform_indices = @transform_0, window_bounds = array<i64: 1, 2, 256>}, {pipeline_mode = #tpu.pipeline_mode<synchronous>, transform_indices = @transform_1, window_bounds = array<i64: 256, 128>}, {pipeline_mode = #tpu.pipeline_mode<synchronous>, transform_indices = @transform_2, window_bounds = array<i64: 1, 128>}, {pipeline_mode = #tpu.pipeline_mode<synchronous>, transform_indices = @transform_3, window_bounds = array<i64: 128, 64>}, {pipeline_mode = #tpu.pipeline_mode<synchronous>, transform_indices = @transform_4, window_bounds = array<i64: 1, 64>}, {pipeline_mode = #tpu.pipeline_mode<synchronous>, transform_indices = @transform_5, window_bounds = array<i64: 64, 128>}, {pipeline_mode = #tpu.pipeline_mode<synchronous>, transform_indices = @transform_6, window_bounds = array<i64: 1, 128>}, {transform_indices = @transform_7, window_bounds = array<i64: 1, 2, 128>}]} {
    %c0 = arith.constant 0 : index
    %c0_0 = arith.constant 0 : index
    %c0_1 = arith.constant 0 : index
    %0 = vector.load %arg1[%c0, %c0_0, %c0_1] : memref<1x2x256xbf16, #tpu.memory_space<vmem>>, vector<1x2x256xbf16>
    %1 = vector.shape_cast %0 : vector<1x2x256xbf16> to vector<2x256xbf16>
    %c0_2 = arith.constant 0 : index
    %c0_3 = arith.constant 0 : index
    %2 = vector.load %arg2[%c0_2, %c0_3] : memref<256x128xbf16, #tpu.memory_space<vmem>>, vector<256x128xbf16>
    %cst = arith.constant dense<0.000000e+00> : vector<2x128xf32>
    %3 = tpu.matmul %1, %2, %cst {dimension_numbers = #tpu.dot_dimension_numbers<[1], [0], [0], [1], [0, 0, 1, 1], [], []>} : vector<2x256xbf16>, vector<256x128xbf16>, vector<2x128xf32> -> vector<2x128xf32>
    %c0_4 = arith.constant 0 : index
    %c0_5 = arith.constant 0 : index
    %4 = vector.load %arg3[%c0_4, %c0_5] : memref<1x128xf32, #tpu.memory_space<vmem>>, vector<1x128xf32>
    %5 = vector.broadcast %4 : vector<1x128xf32> to vector<2x128xf32>
    %6 = arith.addf %3, %5 : vector<2x128xf32>
    %cst_6 = arith.constant 0.000000e+00 : f32
    %7 = vector.broadcast %cst_6 : f32 to vector<2x128xf32>
    %8 = arith.maximumf %6, %7 : vector<2x128xf32>
    %9 = arith.truncf %8 : vector<2x128xf32> to vector<2x128xbf16>
    %c0_7 = arith.constant 0 : index
    %c0_8 = arith.constant 0 : index
    %10 = vector.load %arg4[%c0_7, %c0_8] : memref<128x64xbf16, #tpu.memory_space<vmem>>, vector<128x64xbf16>
    %cst_9 = arith.constant dense<0.000000e+00> : vector<2x64xf32>
    %11 = tpu.matmul %9, %10, %cst_9 {dimension_numbers = #tpu.dot_dimension_numbers<[1], [0], [0], [1], [0, 0, 1, 1], [], []>} : vector<2x128xbf16>, vector<128x64xbf16>, vector<2x64xf32> -> vector<2x64xf32>
    %c0_10 = arith.constant 0 : index
    %c0_11 = arith.constant 0 : index
    %12 = vector.load %arg5[%c0_10, %c0_11] : memref<1x64xf32, #tpu.memory_space<vmem>>, vector<1x64xf32>
    %13 = vector.broadcast %12 : vector<1x64xf32> to vector<2x64xf32>
    %14 = arith.addf %11, %13 : vector<2x64xf32>
    %cst_12 = arith.constant 0.000000e+00 : f32
    %15 = vector.broadcast %cst_12 : f32 to vector<2x64xf32>
    %16 = arith.maximumf %14, %15 : vector<2x64xf32>
    %17 = arith.truncf %16 : vector<2x64xf32> to vector<2x64xbf16>
    %c0_13 = arith.constant 0 : index
    %c0_14 = arith.constant 0 : index
    %18 = vector.load %arg6[%c0_13, %c0_14] : memref<64x128xbf16, #tpu.memory_space<vmem>>, vector<64x128xbf16>
    %cst_15 = arith.constant dense<0.000000e+00> : vector<2x128xf32>
    %19 = tpu.matmul %17, %18, %cst_15 {dimension_numbers = #tpu.dot_dimension_numbers<[1], [0], [0], [1], [0, 0, 1, 1], [], []>} : vector<2x64xbf16>, vector<64x128xbf16>, vector<2x128xf32> -> vector<2x128xf32>
    %c0_16 = arith.constant 0 : index
    %c0_17 = arith.constant 0 : index
    %20 = vector.load %arg7[%c0_16, %c0_17] : memref<1x128xf32, #tpu.memory_space<vmem>>, vector<1x128xf32>
    %21 = vector.broadcast %20 : vector<1x128xf32> to vector<2x128xf32>
    %22 = arith.addf %19, %21 : vector<2x128xf32>
    %c0_18 = arith.constant 0 : index
    %c0_19 = arith.constant 0 : index
    %c0_20 = arith.constant 0 : index
    %23 = vector.load %arg8[%c0_18, %c0_19, %c0_20] : memref<1x2x128xf32, #tpu.memory_space<vmem>>, vector<1x2x128xf32>
    %24 = vector.shape_cast %23 : vector<1x2x128xf32> to vector<2x128xf32>
    %25 = vector.shape_cast %22 : vector<2x128xf32> to vector<1x2x128xf32>
    tpu.vector_store %arg8[%c0_18, %c0_19, %c0_20], %25 {strides = array<i32>} : memref<1x2x128xf32, #tpu.memory_space<vmem>>, vector<1x2x128xf32>,
    return
  }
  func.func @transform_0(%arg0: i32) -> (i32, i32, i32) {
    %c0_i32 = arith.constant 0 : i32
    %c0_i32_0 = arith.constant 0 : i32
    %c0_i32_1 = arith.constant 0 : i32
    return %arg0, %c0_i32, %c0_i32_0 : i32, i32, i32
  }
  func.func @transform_1(%arg0: i32) -> (i32, i32) {
    %c0_i32 = arith.constant 0 : i32
    %c0_i32_0 = arith.constant 0 : i32
    %c0_i32_1 = arith.constant 0 : i32
    return %c0_i32, %c0_i32_0 : i32, i32
  }
  func.func @transform_2(%arg0: i32) -> (i32, i32) {
    %c0_i32 = arith.constant 0 : i32
    %c0_i32_0 = arith.constant 0 : i32
    %c0_i32_1 = arith.constant 0 : i32
    return %c0_i32, %c0_i32_0 : i32, i32
  }
  func.func @transform_3(%arg0: i32) -> (i32, i32) {
    %c0_i32 = arith.constant 0 : i32
    %c0_i32_0 = arith.constant 0 : i32
    %c0_i32_1 = arith.constant 0 : i32
    return %c0_i32, %c0_i32_0 : i32, i32
  }
  func.func @transform_4(%arg0: i32) -> (i32, i32) {
    %c0_i32 = arith.constant 0 : i32
    %c0_i32_0 = arith.constant 0 : i32
    %c0_i32_1 = arith.constant 0 : i32
    return %c0_i32, %c0_i32_0 : i32, i32
  }
  func.func @transform_5(%arg0: i32) -> (i32, i32) {
    %c0_i32 = arith.constant 0 : i32
    %c0_i32_0 = arith.constant 0 : i32
    %c0_i32_1 = arith.constant 0 : i32
    return %c0_i32, %c0_i32_0 : i32, i32
  }
  func.func @transform_6(%arg0: i32) -> (i32, i32) {
    %c0_i32 = arith.constant 0 : i32
    %c0_i32_0 = arith.constant 0 : i32
    %c0_i32_1 = arith.constant 0 : i32
    return %c0_i32, %c0_i32_0 : i32, i32
  }
  func.func @transform_7(%arg0: i32) -> (i32, i32, i32) {
    %c0_i32 = arith.constant 0 : i32
    %c0_i32_0 = arith.constant 0 : i32
    %c0_i32_1 = arith.constant 0 : i32
    return %arg0, %c0_i32, %c0_i32_0 : i32, i32, i32
  }
}

</mosaic_0001>

<bundles_post_ra>
// kernel: tpu_custom_call.1
= control target key start
LH: loop header
LB: loop body
LE: loop exit
PB: predicated region body
PF: predicated region fallthrough
CT: control target
= control target key end

     0   :  { %12 = vsyncpa [#allocation3], 0  ;;  %s1308_s0 = inlined_call_operand.vmem [shape: bf16[2,2,256], index: 0, kind: input, shape index: {}]   ;;  %s1309_s1 = inlined_call_operand.hbm [shape: bf16[256,128], index: 1, kind: input, shape index: {}]   ;;  %s1310_s2 = inlined_call_operand.vmem [shape: f32[1,128], index: 2, kind: input, shape index: {}]   ;;  %s1311_s3 = inlined_call_operand.vmem [shape: bf16[128,64], index: 3, kind: input, shape index: {}]   ;;  %s1312_s4 = inlined_call_operand.vmem [shape: f32[1,64], index: 4, kind: input, shape index: {}]   ;;  %s1313_s5 = inlined_call_operand.vmem [shape: bf16[64,128], index: 5, kind: input, shape index: {}]   ;;  %s1314_s6 = inlined_call_operand.vmem [shape: f32[1,128], index: 6, kind: input, shape index: {}]   ;;  %s1315_s7 = inlined_call_operand.hbm [shape: f32[2,2,128], index: 7, kind: output, shape index: {}]  }
   0x1   :  { %13 = vsyncpa [#allocation4], 0 }
   0x2   :  { %15 = vsyncpa [#allocation4 + $0x1], 0  ;;  %s1114_s24 = smov 0   ;;  %s1116_s25 = smov 0  }
   0x3   :  { %s1118_s26 = smov 0   ;;  %s1120_s27 = smov 0  }
   0x4 LB: > { %s1135_s28 = sadd.s32 4294967295, %s1065_s27   ;;  %s775_s29 = sadd.s32 4294967294, %s1065_s27   ;;  %s1065_s27 = sphi %s1120_s27, %s1331_s27   ;;  %s1061_s26 = sphi %s1118_s26, %s1330_s26   ;;  %s1057_s25 = sphi %s1116_s25, %s1329_s25   ;;  %s1053_s24 = sphi %s1114_s24, %s1328_s24  }
   0x5   : > { %s1139_s30 = sadd.s32 1, %s1065_s27   ;;  %s180_s8 = sadd.s32 1, %s1061_s26 }
   0x6   : > { %s177_s9 = ssub.s32 %s1065_s27, %s1139_s30  ;;  %p190_p0 = scmp.ne.s32.totalorder %s1061_s26, %s1057_s25 }
   0x7   : > { %p178_p1 = scmp.eq.s32.totalorder %s177_s9, 0  ;;  %p191_p2 = scmp.eq.s32.totalorder %s1135_s28, 1 }
   0x8   : > { %p196_p3 = scmp.ne.s32.totalorder %s1057_s25, %s1053_s24  ;;  %p197_p4 = scmp.eq.s32.totalorder %s775_s29, 1 }
   0x9   : > { %s1150_s10 = scalar_select %p178_p1, %s1061_s26, %s180_s8  }
   0xa   : > { %p1152_p5 = por %p191_p2, %p190_p0  ;;  %p1156_p6 = por %p197_p4, %p196_p3 }
   0xb   : > { %p776_p7 = scmp.ge.s32.totalorder %s1065_s27, 1  ;;  %p204_p8 = scmp.lt.s32.totalorder %s1065_s27, 3 }
   0xc   : > { %s1319_s11 = scalar_select %p1152_p5, 1, 0 }
   0xd   : > { %s1320_s12 = scalar_select %p1156_p6, 1, 0 }
   0xe   : > { %p1316_p9 = scmp.eq.s32.totalorder %s1135_s28, 0  ;;  %p1163_p10 = pnand %p776_p7, %p204_p8 }
   0xf   : > { %s1067_s14 = smov [#allocation2]   ;;  %s971_s19 = scalar_lea.hbm %s1309_s1, 2048 }
  0x10   : > { %s1321_s13 = scalar_select %p1163_p10, 1, 0 }
  0x11   : > { %s216_s15 = sshll.u32 %s1067_s14, 4  ;;  %p894_p11 = pneg %p1163_p10  ;;  %s217_s15 = int_to_ptr.vmem [resolvable:$true] %s216_s15 }
  0x12   : > { %p972_p13 = scmp.ne.s32.totalorder %s1309_s1, %s971_s19  ;;  %p978_p3 = scmp.lt.u32.totalorder %s971_s19, %s1309_s1 }
  0x13   : > { %p1171_p12 = pnand %p1316_p9, %p894_p11 }
  0x15   : > { %p973_p0 = pneg %p1171_p12 }
  0x17   : > { %p974_p1 = pnand %p973_p0, %p972_p13 }
  0x19   : > { %p975_p2 = pneg %p974_p1 }
  0x1b   : > { %p980_p4 = pnand %p978_p3, %p975_p2 }
  0x1d   : > { %983 = shalt.err (!%p980_p4)
}
  0x1e   : > { %s984_s29 = scalar_lea.vmem %s217_s15, 2048  ;;  %p992_p9 = scmp.lt.s32.totalorder %s217_s15, %s217_s15 }
  0x1f   : > { %p985_p7 = scmp.ne.s32.totalorder %s217_s15, %s984_s29  ;;  %p993_p6 = scmp.lt.s32.totalorder %s984_s29, %s984_s29 }
  0x21   : > { %p987_p8 = pnand %p985_p7, %p973_p0  ;;  %p994_p5 = por %p993_p6, %p992_p9 }
  0x23   : > { %p988_p11 = pneg %p987_p8 }
  0x25   : > { %p995_p10 = pnand %p994_p5, %p988_p11 }
  0x27   : > { %998 = shalt.err (!%p995_p10)
}
  0x28   : > { %s1068_s8 = smov 64   ;;  %s1069_s9 = smov 4  }
  0x29   : > { %897 = dma.hbm_to_vmem [thread:$0]  (!%p1171_p12), %s1309_s1, 2048, %s217_s15, [#allocation3], %s1068_s8, %s1068_s8, %s1069_s9  }
  0x2a   : > { %p1323_p13 = scmp.ne.s32.totalorder %s1321_s13, 0 }
  0x2b   : > { %p1324_p1 = scmp.eq.s32.totalorder (!%p1323_p13), %s1135_s28, 0 }
  0x2c   : > { %254 = sbr.rel (%p1323_p13) target bundleno = 752 (0x2f0), region = 48 }
  0x33   : > { %1044 = dma.done.wait (%p1324_p1), [#allocation3], 2048   ;;  %p1325_p0 = pmov %p1324_p1 }
  0x34   : > { %v1070_v0 = vmov 0.0   ;;  %v943_v1 = vld [vmem:[#allocation2 + $0x40] sm:$0xff]   ;;  %v945_v3 = vld [vmem:[#allocation2 + $0x48] sm:$0xff]   ;;  %p285_p5 = scmp.lt.s32.totalorder %s1135_s28, 1  ;;  %v947_v5 = vld [vmem:[#allocation2 + $0x50] sm:$0xff]   ;;  %v342_v9 = vlaneseq  ;;  %vm1072_vm0 = vmmov 0  }
  0x35   : > { %1046 = vsyncadd (%p1325_p0), [#allocation3], 4294965248  ;;  %856 = vmatprep.subr.bf16.mxu1 %v1070_v0  ;;  %v944_v2 = vld [vmem:[#allocation2] sm:$0xff]   ;;  %820 = vmatprep.subr.bf16.mxu0 %v943_v1  ;;  %v946_v4 = vld [vmem:[#allocation2 + $0x8] sm:$0xff]   ;;  %v1071_v7 = vmov 1966171168  }
  0x36   : > { %821 = vmatpush3.bf16.msra.mxu0 %v944_v2  ;;  %s286_s13 = scalar_select %p285_p5, %s1135_s28, 1  ;;  %v948_v6 = vld [vmem:[#allocation2 + $0x10] sm:$0xff]   ;;  %v340_v8 = vunpack.c.l.s4 %v1071_v7  ;;  %v949_v10 = vld [vmem:[#allocation2 + $0x58] sm:$0xff]   ;;  %v343_v13 = vshrl.u32 %v342_v9, 7  ;;  %v951_v14 = vld [vmem:[#allocation2 + $0x60] sm:$0xff]   ;;  %872 = vmatprep.mubr.msk.bf16.mxu1 %vm1072_vm0, %v1070_v0  ;;  %vm645_vm1 = vcmask 523264  }
  0x37   : > { %822 = vmatprep.subr.bf16.mxu0 %v945_v3  ;;  %v950_v11 = vld [vmem:[#allocation2 + $0x18] sm:$0xff]   ;;  %v952_v15 = vld [vmem:[#allocation2 + $0x20] sm:$0xff]   ;;  %v953_v16 = vld [vmem:[#allocation2 + $0x68] sm:$0xff]   ;;  %s282_s20 = sand.u32 1, %s1057_s25   ;;  %s817_s29 = sshll.u32 %s1135_s28, 5 }
  0x38   : > { %s782_s15 = sshll.u32 %s286_s13, 1  ;;  %v341_v12 = vunpack.c.0.s8 %v340_v8  ;;  %v959_v20 = vld [vmem:[%s1311_s3] sm:$0xff]   ;;  %v954_v21 = vld [vmem:[#allocation2 + $0x28] sm:$0xff]   ;;  %v955_v24 = vld [vmem:[#allocation2 + $0x70] sm:$0xff]   ;;  %s781_s21 = sshll.u32 %s282_s20, 1 }
  0x39   : > { %s288_s19 = scalar_lea.vmem %s1308_s0, %s782_s15  ;;  %857 = vmatpush3.bf16.msra.mxu1 %v959_v20  ;;  %v960_v23 = vld [vmem:[%s1311_s3 + $0x8] sm:$0xff]   ;;  %v956_v25 = vld [vmem:[#allocation2 + $0x30] sm:$0xff]   ;;  %v957_v26 = vld [vmem:[#allocation2 + $0x78] sm:$0xff]   ;;  %s284_s8 = scalar_lea.vmem [#allocation5], %s781_s21 }
  0x3a   : > { %823 = vmatpush3.bf16.msra.mxu0 %v946_v4  ;;  %v344_v17 = vsub.s32 %v341_v12, %v343_v13  ;;  %v784_v18 = vld.sshfl [vmem:[%s288_s19] sm:$0x11 pattern:$0x75316420]  ;;  %858 = vmatprep.subr.bf16.mxu1 %v1070_v0  ;;  %v961_v27 = vld [vmem:[%s1311_s3 + $0x10] sm:$0xff]   ;;  %v958_v28 = vld [vmem:[#allocation2 + $0x38] sm:$0xff]   ;;  %s1266_s13 = scalar_lea.hbm %s1315_s7, %s817_s29 }
  0x3b   : > { %824 = vmatprep.subr.bf16.mxu0 %v947_v5  ;;  %v338_v19 = vcombine.high %v784_v18, %v784_v18  ;;  %v962_v29 = vld [vmem:[%s1311_s3 + $0x18] sm:$0xff]   ;;  %v963_v31 = vld [vmem:[%s1311_s3 + $0x20] sm:$0xff]   ;;  %v964_v32 = vld [vmem:[%s1311_s3 + $0x28] sm:$0xff]   ;;  %s704_s9 = sshll.u32 %s284_s8, 4  ;;  %s691_s15 = scalar_lea.sflag [#allocation4], %s282_s20  ;;  %s1268_s9 = int_to_ptr.vmem [resolvable:$true] %s704_s9 }
  0x3c   : > { %v345_v30 = vrot.slane %v784_v18, %v344_v17  ;;  %v965_v33 = vld [vmem:[%s1311_s3 + $0x30] sm:$0xff]   ;;  %v966_v34 = vld [vmem:[%s1311_s3 + $0x38] sm:$0xff]   ;;  %v967_v35 = vld [vmem:[%s1313_s5] sm:$0xff]   ;;  %s999_s28 = scalar_lea.vmem %s1268_s9, 32  ;;  %p1326_p9 = scmp.ne.s32.totalorder %s1319_s11, 0 }
  0x3d   : > { %v352_v22 = vrot.slane %v338_v19, %v344_v17  ;;  %859 = vmatpush3.bf16.msra.mxu1 %v960_v23  ;;  %v968_v36 = vld [vmem:[%s1313_s5 + $0x8] sm:$0xff]   ;;  %v783_v38 = vld [vmem:[%s1310_s2] ss:$0 sm:$0xff]  ;;  %v969_v46 = vld [vmem:[%s1313_s5 + $0x10] sm:$0xff]   ;;  %p1000_p6 = scmp.ne.s32.totalorder %s1268_s9, %s999_s28  ;;  %s1073_s16 = smov [#allocation5]  }
  0x3e   : > { %825 = vmatpush3.bf16.msra.mxu0 %v948_v6  ;;  %860 = vmatprep.subr.bf16.mxu1 %v1070_v0  ;;  %v970_v47 = vld [vmem:[%s1313_s5 + $0x18] sm:$0xff]   ;;  %v801_v48 = vld [vmem:[%s1312_s4] ss:$0 sm:$0xff]  ;;  %s1003_s18 = sshll.u32 %s1073_s16, 4  ;;  %s1004_s18 = int_to_ptr.vmem [resolvable:$false] %s1003_s18 }
  0x3f   : > { %826 = vmatprep.subr.bf16.mxu0 %v949_v10  ;;  %483 = vmatprep.mubr.bf16.mxu0 %v352_v22  ;;  %v810_v56 = vld [vmem:[%s1314_s6] ss:$0 sm:$0xff]  ;;  %p1001_p10 = pnand %p1000_p6, %p1326_p9  ;;  %s1005_s19 = scalar_lea.vmem %s1004_s18, 64 }
  0x40   : > { %p1006_p2 = scmp.lt.s32.totalorder %s1268_s9, %s1004_s18  ;;  %p1007_p3 = scmp.lt.s32.totalorder %s1005_s19, %s999_s28 }
  0x41   : > { %861 = vmatpush3.bf16.msra.mxu1 %v961_v27  ;;  %p1002_p12 = pneg %p1001_p10 }
  0x42   : > { %827 = vmatpush3.bf16.msra.mxu0 %v950_v11  ;;  %862 = vmatprep.subr.bf16.mxu1 %v1070_v0  ;;  %p1008_p4 = por %p1007_p3, %p1006_p2 }
  0x43   : > { %828 = vmatprep.subr.bf16.mxu0 %v951_v14 }
  0x44   : > { %p1009_p7 = pnand %p1008_p4, %p1002_p12 }
  0x45   : > { %863 = vmatpush3.bf16.msra.mxu1 %v962_v29 }
  0x46   : > { %829 = vmatpush3.bf16.msra.mxu0 %v952_v15  ;;  %864 = vmatprep.subr.bf16.mxu1 %v1070_v0 }
  0x47   : > { %830 = vmatprep.subr.bf16.mxu0 %v953_v16 }
  0x49   : > { %865 = vmatpush3.bf16.msra.mxu1 %v963_v31 }
  0x4a   : > { %831 = vmatpush3.bf16.msra.mxu0 %v954_v21  ;;  %866 = vmatprep.subr.bf16.mxu1 %v1070_v0 }
  0x4b   : > { %832 = vmatprep.subr.bf16.mxu0 %v955_v24 }
  0x4d   : > { %867 = vmatpush3.bf16.msra.mxu1 %v964_v32 }
  0x4e   : > { %833 = vmatpush3.bf16.msra.mxu0 %v956_v25  ;;  %868 = vmatprep.subr.bf16.mxu1 %v1070_v0 }
  0x4f   : > { %834 = vmatprep.subr.bf16.mxu0 %v957_v26 }
  0x51   : > { %869 = vmatpush3.bf16.msra.mxu1 %v965_v33 }
  0x52   : > { %835 = vmatpush3.bf16.msra.mxu0 %v958_v28  ;;  %870 = vmatprep.subr.bf16.mxu1 %v1070_v0 }
  0x53   : > { %876 = vmatprep.subr.bf16.mxu0 %v1070_v0 }
  0x55   : > { %484 = vmatmul.mubr.bf16.vlgmr.msra.gmra.mrb[0].mxu0 %v345_v30  ;;  %871 = vmatpush3.bf16.msra.mxu1 %v966_v34 }
  0x56   : > { %884 = vmatprep.mubr.msk.bf16.mxu0 %vm1072_vm0, %v1070_v0  ;;  %877 = vmatpush3.bf16.msra.mxu0 %v967_v35 }
  0x57   : > { %878 = vmatprep.subr.bf16.mxu0 %v1070_v0 }
  0x5a   : > { %879 = vmatpush3.bf16.msra.mxu0 %v968_v36 }
  0x5b   : > { %880 = vmatprep.subr.bf16.mxu0 %v1070_v0 }
  0x5e   : > { %881 = vmatpush3.bf16.msra.mxu0 %v969_v46 }
  0x5f   : > { %882 = vmatprep.subr.bf16.mxu0 %v1070_v0 }
  0x62   : > { %883 = vmatpush3.bf16.msra.mxu0 %v970_v47 }
 0x128   : > { %v836_v37 = vpop.f32.mrb[0].mxu0 }
 0x129   : > { %v837_v39 = vpop.f32.mrb[1].mxu0 }
 0x12a   : > { %v838_v40 = vadd.f32 %v837_v39, %v836_v37  ;;  %v839_v41 = vpop.f32.mrb[2].mxu0 }
 0x12b   : > { %v840_v42 = vpop.f32.mrb[3].mxu0 }
 0x12c   : > { %v486_v43 = vadd.f32 %v838_v40, %v783_v38 }
 0x12e   : > { %v491_v44 = vmax.f32 %v486_v43, 0.0 }
 0x130   : > { %v492_v45 = vpack.c.bf16 %v491_v44, %v491_v44 }
 0x132   : > { %873 = vmatmul.mubr.bf16.vlgmr.msra.gmra.mrb[0].mxu1 %v492_v45 }
 0x205   : > { %v598_v49 = vpop.f32.mrb[0].mxu1 }
 0x206   : > { %v599_v50 = vadd.f32 %v801_v48, %v598_v49  ;;  %v874_v51 = vpop.f32.mrb[1].mxu1 }
 0x207   : > { %v601_v52 = vpop.f32.mrb[2].mxu1 }
 0x208   : > { %v604_v53 = vmax.f32 %v599_v50, 0.0  ;;  %v875_v54 = vpop.f32.mrb[3].mxu1 }
 0x20a   : > { %v605_v55 = vpack.c.bf16 %v604_v53, %v604_v53 }
 0x20c   : > { %885 = vmatmul.mubr.msk.bf16.vlgmr.msra.gmra.mrb[4].mxu0 %vm645_vm1, %v605_v55 }
 0x2df   : > { %v683_v57 = vpop.f32.mrb[4].mxu0 }
 0x2e0   : > { %v684_v58 = vadd.f32 %v810_v56, %v683_v57  ;;  %v886_v59 = vpop.f32.mrb[5].mxu0 }
 0x2e1   : > { %v686_v60 = vpop.f32.mrb[6].mxu0 }
 0x2e2   : > { %689 = vst [vmem:[%s284_s8] sm:$0x3] %v684_v58  ;;  %v887_v61 = vpop.f32.mrb[7].mxu0 }
 0x2e3   : > { %1012 = shalt.err (!%p1009_p7)
}
 0x2e4   : > { %s1013_s20 = scalar_lea.hbm %s1266_s13, 32  ;;  %s1017_s23 = scalar_lea.hbm %s1315_s7, 64 }
 0x2e5   : > { %p1014_p8 = scmp.ne.s32.totalorder %s1266_s13, %s1013_s20  ;;  %p1018_p1 = scmp.lt.u32.totalorder %s1266_s13, %s1315_s7 }
 0x2e6   : > { %p1019_p0 = scmp.lt.u32.totalorder %s1017_s23, %s1013_s20  ;;  %p1021_p6 = scmp.lt.u32.totalorder %s1013_s20, %s1266_s13 }
 0x2e7   : > { %p1015_p11 = pnand %p1014_p8, %p1326_p9 }
 0x2e8   : > { %p1020_p5 = por %p1019_p0, %p1018_p1 }
 0x2e9   : > { %p1016_p13 = pneg %p1015_p11 }
 0x2ea   : > { %p1022_p10 = por %p1021_p6, %p1020_p5 }
 0x2ec   : > { %p1023_p12 = pnand %p1022_p10, %p1016_p13 }
 0x2ee   : > { %1026 = shalt.err (!%p1023_p12)
}
 0x2ef   : > { %892 = dma.vmem_to_hbm [thread:$0]  (%p1326_p9), %s1268_s9, 32, %s1266_s13, %s691_s15  }
 0x2f0 PF: > { %p904_p2 = scmp.ge.s32.totalorder %s1065_s27, 2  ;;  %s716_s14 = sand.u32 1, %s1053_s24  }
 0x2f1   : > { %p1327_p3 = scmp.ne.s32.totalorder %s1320_s12, 0  ;;  %s717_s17 = scalar_lea.sflag [#allocation4], %s716_s14 }
 0x2f3   : > { %p899_p4 = pnand %p904_p2, %p1327_p3 }
 0x2f5   : > { %1048 = dma.done.wait (!%p899_p4), %s717_s17, 32  }
 0x2f6   : > { %1050 = vsyncadd (!%p899_p4), %s717_s17, 4294967264  ;;  %p18_p7 = scmp.ge.s32.totalorder %s1139_s30, 4   ;;  %s1328_s24 = smov %s1057_s25 }
 0x2f7   : > { %s1329_s25 = smov %s1061_s26  ;;  %s1330_s26 = smov %s1150_s10 }
 0x2f8   : > { %s1331_s27 = smov %s1139_s30  ;;  %20 = sbr.rel (!%p18_p7) target bundleno = 4 (0x4), region = 88 }
 0x2ff   :  { %722 = vsyncpa [#allocation3], 1 }
 0x300   :  { %724 = vsyncpa [#allocation3 + $0x1], 1 }
 0x301   :  { %725 = vsyncpa [#allocation4], 1 }
 0x302   :  { %727 = vsyncpa [#allocation4 + $0x1], 1 }

</bundles_post_ra>
